<compile_context>
chip_gen: v7x
topology: tpu7x:2x2x1
jax: 0.10.0
libtpu: 0.0.40
codegen_flags: <defaults>
</compile_context>

<pallas_src>
import math

import jax
import jax.numpy as jnp
import numpy as np
from jax.experimental import pallas as pl
from jax.experimental.pallas import tpu as pltpu


def _round_up(n, m):
    return ((n + m - 1) // m) * m


def _vmem_budget_bytes():
    """Scoped-VMEM budget: ~100 MiB on 128 MiB parts, <=56 MiB on 64 MiB parts."""
    cap = 64 << 20                    # conservative fallback (v7x: 64 MiB/TC)
    try:
        cap = int(pltpu.get_tpu_info().vmem_capacity_bytes)
    except Exception:
        pass
    return min(cap - (8 << 20), 100 << 20)


def _make_kernel(seq_len, chunk, hidden_p, mask_tail):
    """Builds the recurrence kernel for one (batch_tile, seq_chunk) grid cell.

    Refs:
      p_ref : (I, 2Hp)        stacked input weights  [p_z.T | p.T]
      b_ref : (1, 2Hp)  f32   stacked biases         [b_z.T | b.T]
      w_ref : (Hp, 2Hp)       stacked recurrent wts  [w_z.T | w.T]
      x_ref : (chunk, Bt, I)  raw inputs for this sequence chunk
      o_ref : (Bt, Hp)  f32   hidden state; resident across the seq-chunk axis
    """

    def kernel(p_ref, b_ref, w_ref, x_ref, o_ref):
        @pl.when(pl.program_id(1) == 0)
        def _init():
            o_ref[...] = jnp.zeros_like(o_ref)

        w_stk = w_ref[...]            # loaded once per chunk, stays in vregs
        p_stk = p_ref[...]
        bias = b_ref[...]
        two_h = w_stk.shape[1]

        # One tanh over the full (Bt, 2Hp) gives both activations:
        #   sigmoid(a) = 0.5 * (tanh(0.5 * a) + 1)       (z half, scale 0.5)
        #   tanh(a)                                       (c half, scale 1.0)
        col = jax.lax.broadcasted_iota(jnp.int32, (1, two_h), 1)
        half_scale = jnp.where(col < hidden_p, 0.5, 1.0)

        base = pl.program_id(1) * chunk

        def step(t, h):
            # Input projection: independent of h, so it sits off the serial
            # dependency chain and overlaps the previous step's EUP/VPU tail.
            u_t = jnp.dot(x_ref[t], p_stk,
                          preferred_element_type=jnp.float32) + bias
            # Single fused recurrent MXU dot: (Bt, Hp) @ (Hp, 2Hp).
            g = jnp.dot(h.astype(w_stk.dtype), w_stk,
                        preferred_element_type=jnp.float32) + u_t
            th = jnp.tanh(g * half_scale)           # one EUP push per step
            z = 0.5 * (th[:, :hidden_p] + 1.0)      # sigmoid(update gate)
            c = th[:, hidden_p:]                    # candidate state
            h_new = c + z * (h - c)                 # == z*h + (1-z)*c, 3 VPU ops
            if mask_tail:
                # Masked tail: padded timesteps leave h unchanged.
                h_new = jnp.where(base + t < seq_len, h_new, h)
            return h_new

        unroll = True if chunk <= 32 else 8
        o_ref[...] = jax.lax.fori_loop(0, chunk, step, o_ref[...],
                                       unroll=unroll)

    return kernel


def trainable_z_forward(x, params, *, use_bf16=True, chunk=None,
                        batch_tiles=1, max_chunk=512):
    """Forward pass of `trainableZ` (batch_first=True, zero initial state).

    x: (batch, seq, input_size) float32.  Returns (batch, hidden) == rnncell.h_t.
    batch_tiles: set to 2 on v7x (2 TensorCores) when batch >= 16.
    """
    batch, seq, input_size = x.shape
    hidden = params["w"].shape[0]
    x = x.astype(jnp.float32)

    mm_dtype = jnp.bfloat16 if use_bf16 else jnp.float32
    bytes_mm = jnp.dtype(mm_dtype).itemsize

    # ---- lane/sublane-aligned padded sizes ---------------------------------
    hp = _round_up(hidden, 128)       # z/c split lands on a vreg boundary
    bp = _round_up(batch, 8)          # sublane-aligned batch
    if batch_tiles < 1 or bp % batch_tiles != 0 or (bp // batch_tiles) % 8 != 0:
        batch_tiles = 1
    bt = bp // batch_tiles

    # ---- stacked, zero-padded parameters (padding is mathematically inert) --
    def pad2(a, rows, cols):
        return jnp.pad(a, ((0, rows - a.shape[0]), (0, cols - a.shape[1])))

    w_stk = jnp.concatenate([pad2(params["w_z"].T, hp, hp),
                             pad2(params["w"].T, hp, hp)], axis=1)          # (Hp, 2Hp)
    p_stk = jnp.concatenate([pad2(params["p_z"].T, input_size, hp),
                             pad2(params["p"].T, input_size, hp)], axis=1)  # (I, 2Hp)
    b_stk = jnp.concatenate([pad2(params["b_z"].T, 1, hp),
                             pad2(params["b"].T, 1, hp)], axis=1)           # (1, 2Hp)
    w_stk = w_stk.astype(mm_dtype)
    p_stk = p_stk.astype(mm_dtype)
    b_stk = b_stk.astype(jnp.float32)

    # ---- chunk size from the VMEM budget ------------------------------------
    budget = _vmem_budget_bytes()
    fixed = 2 * (hp * 2 * hp + input_size * 2 * hp) * bytes_mm   # w/p blocks, 2 bufs
    fixed += 2 * 2 * hp * 4                                      # bias block, 2 bufs
    fixed += 2 * bt * hp * 4                                     # h output block
    fixed += 2 << 20                                             # compiler slack
    per_step = bt * 2 * input_size * bytes_mm                    # double-buffered x rows
    if chunk is None:
        chunk = max(1, (budget - fixed) // per_step)
        chunk = int(min(chunk, seq, max_chunk))
        if chunk > 32:
            chunk = (chunk // 8) * 8                             # exact unroll=8 blocks
    chunk = int(max(1, min(chunk, seq)))
    n_chunks = -(-seq // chunk)
    seq_pad = n_chunks * chunk
    mask_tail = (seq_pad != seq)
    vmem_limit = int(max(budget, fixed + chunk * per_step + (2 << 20)))

    # ---- x laid out (seq, batch, input), padded, streamed in mm_dtype --------
    xt = jnp.transpose(x, (1, 0, 2))
    xt = jnp.pad(xt, ((0, seq_pad - seq), (0, bp - batch), (0, 0)))
    xt = xt.astype(mm_dtype)

    kernel = _make_kernel(seq, chunk, hp, mask_tail)

    out = pl.pallas_call(
        kernel,
        out_shape=jax.ShapeDtypeStruct((bp, hp), jnp.float32),
        grid_spec=pltpu.PrefetchScalarGridSpec(
            num_scalar_prefetch=0,
            grid=(batch_tiles, n_chunks),
            in_specs=[
                # Weights/biases: constant block index -> stay resident.
                pl.BlockSpec((input_size, 2 * hp), lambda b, s: (0, 0)),
                pl.BlockSpec((1, 2 * hp), lambda b, s: (0, 0)),
                pl.BlockSpec((hp, 2 * hp), lambda b, s: (0, 0)),
                # One sequence chunk of raw inputs; the next chunk is
                # DMA-prefetched while this one runs the recurrence.
                pl.BlockSpec((chunk, bt, input_size), lambda b, s: (s, b, 0)),
            ],
            out_specs=pl.BlockSpec((bt, hp), lambda b, s: (b, 0)),
        ),
        compiler_params=pltpu.CompilerParams(
            dimension_semantics=("parallel", "arbitrary"),  # seq axis is serial
            vmem_limit_bytes=vmem_limit,
        ),
    )(p_stk, b_stk, w_stk, xt)

    return out[:batch, :hidden]


def _reference_forward_np(x, params):
    """Float64 NumPy replica of the PyTorch module (ground truth)."""
    xp = np.asarray(x, np.float64)
    P = {k: np.asarray(v, np.float64) for k, v in params.items()}
    batch, seq, _ = xp.shape
    hidden = P["w"].shape[0]
    h = np.zeros((hidden, batch), np.float64)   # zeros(1,H).T broadcasts to (H,B)
    for n in range(seq):
        x_t = xp[:, n, :].T                                            # (I, B)
        z = 1.0 / (1.0 + np.exp(-(P["w_z"] @ h + P["p_z"] @ x_t + P["b_z"])))
        c = np.tanh(P["w"] @ h + P["p"] @ x_t + P["b"])
        h = z * h + (1.0 - z) * c
    return h.T                                                         # (B, H)


def init_params(key, input_size, hidden_size):
    """uniform(-1/sqrt(H), 1/sqrt(H)) for every parameter, as in the module."""
    bound = 1.0 / math.sqrt(hidden_size)
    ks = jax.random.split(key, 6)
    u = lambda k, shape: jax.random.uniform(
        k, shape, dtype=jnp.float32, minval=-bound, maxval=bound)
    return {
        "w_z": u(ks[0], (hidden_size, hidden_size)),
        "p_z": u(ks[1], (hidden_size, input_size)),
        "b_z": u(ks[2], (hidden_size, 1)),
        "w":   u(ks[3], (hidden_size, hidden_size)),
        "p":   u(ks[4], (hidden_size, input_size)),
        "b":   u(ks[5], (hidden_size, 1)),
    }


if __name__ == "__main__":
    batch, seq, input_size, hidden_size = 2, 8, 16, 32

    key = jax.random.PRNGKey(0)
    k_param, k_x = jax.random.split(key)
    params = init_params(k_param, input_size, hidden_size)
    x = jax.random.normal(k_x, (batch, seq, input_size), dtype=jnp.float32)

    ref = _reference_forward_np(x, params)

    # f32-matmul path, auto chunk (single sequence chunk at this size):
    # tight check of recurrence / padding / layout logic.
    out_f32 = jax.block_until_ready(
        trainable_z_forward(x, params, use_bf16=False))
    np.testing.assert_allclose(np.asarray(out_f32), ref, rtol=1e-4, atol=1e-4)

    # f32 path with a forced non-divisor chunk: exercises the multi-chunk
    # h carry across the grid and the masked tail (8 = 3 + 3 + 2).
    out_tail = jax.block_until_ready(
        trainable_z_forward(x, params, use_bf16=False, chunk=3))
    np.testing.assert_allclose(np.asarray(out_tail), ref, rtol=1e-4, atol=1e-4)

    # bf16-MXU-input path (optimized default): tolerance loosened because the
    # matmul inputs (x, weights, h) are rounded to bf16 (f32 accumulation).
    out_bf16 = jax.block_until_ready(trainable_z_forward(x, params))
    np.testing.assert_allclose(np.asarray(out_bf16), ref, rtol=2e-2, atol=2e-2)

    print("KERNEL_OK")
</pallas_src>

<mosaic_0001>
module attributes {stable_mosaic.version = 11 : i64} {
  func.func @kernel(%arg0: i32, %arg1: i32, %arg2: memref<16x256xf32, #tpu.memory_space<vmem>>, %arg3: memref<1x256xf32, #tpu.memory_space<vmem>>, %arg4: memref<128x256xf32, #tpu.memory_space<vmem>>, %arg5: memref<8x8x16xf32, #tpu.memory_space<vmem>>, %arg6: memref<8x128xf32, #tpu.memory_space<vmem>>) attributes {dimension_semantics = [#tpu.dimension_semantics<parallel>, #tpu.dimension_semantics<arbitrary>], iteration_bounds = array<i64: 1, 1>, scalar_prefetch = 0 : i64, scratch_operands = 0 : i64, tpu.core_type = #tpu.core_type<tc>, window_params = [{pipeline_mode = #tpu.pipeline_mode<synchronous>, transform_indices = @transform_0, window_bounds = array<i64: 16, 256>}, {pipeline_mode = #tpu.pipeline_mode<synchronous>, transform_indices = @transform_1, window_bounds = array<i64: 1, 256>}, {pipeline_mode = #tpu.pipeline_mode<synchronous>, transform_indices = @transform_2, window_bounds = array<i64: 128, 256>}, {transform_indices = @transform_3, window_bounds = array<i64: 8, 8, 16>}, {transform_indices = @transform_4, window_bounds = array<i64: 8, 128>}]} {
    %c0_i32 = arith.constant 0 : i32
    %0 = arith.cmpi eq, %arg1, %c0_i32 : i32
    %1 = arith.extui %0 : i1 to i32
    %c0_i32_0 = arith.constant 0 : i32
    %2 = arith.cmpi ne, %1, %c0_i32_0 : i32
    scf.if %2 {
      %cst_60 = arith.constant 0.000000e+00 : f32
      %174 = vector.broadcast %cst_60 : f32 to vector<8x128xf32>
      %c0_61 = arith.constant 0 : index
      %c0_62 = arith.constant 0 : index
      %175 = vector.load %arg6[%c0_61, %c0_62] : memref<8x128xf32, #tpu.memory_space<vmem>>, vector<8x128xf32>
      tpu.vector_store %arg6[%c0_61, %c0_62], %174 {strides = array<i32>} : memref<8x128xf32, #tpu.memory_space<vmem>>, vector<8x128xf32>,
    } else {
    }
    %c0 = arith.constant 0 : index
    %c0_1 = arith.constant 0 : index
    %3 = vector.load %arg4[%c0, %c0_1] : memref<128x256xf32, #tpu.memory_space<vmem>>, vector<128x256xf32>
    %c0_2 = arith.constant 0 : index
    %c0_3 = arith.constant 0 : index
    %4 = vector.load %arg2[%c0_2, %c0_3] : memref<16x256xf32, #tpu.memory_space<vmem>>, vector<16x256xf32>
    %c0_4 = arith.constant 0 : index
    %c0_5 = arith.constant 0 : index
    %5 = vector.load %arg3[%c0_4, %c0_5] : memref<1x256xf32, #tpu.memory_space<vmem>>, vector<1x256xf32>
    %6 = tpu.iota {dimensions = array<i32: 1>} : vector<1x256xi32>
    %c128_i32 = arith.constant 128 : i32
    %7 = vector.broadcast %c128_i32 : i32 to vector<1x256xi32>
    %8 = arith.cmpi slt, %6, %7 : vector<1x256xi32>
    %cst = arith.constant 5.000000e-01 : f32
    %cst_6 = arith.constant 1.000000e+00 : f32
    %9 = vector.broadcast %cst : f32 to vector<1x256xf32>
    %10 = vector.broadcast %cst_6 : f32 to vector<1x256xf32>
    %11 = arith.select %8, %9, %10 : vector<1x256xi1>, vector<1x256xf32>
    %c0_7 = arith.constant 0 : index
    %c0_8 = arith.constant 0 : index
    %12 = vector.load %arg6[%c0_7, %c0_8] : memref<8x128xf32, #tpu.memory_space<vmem>>, vector<8x128xf32>
    %c0_i32_9 = arith.constant 0 : i32
    %13 = arith.index_cast %c0_i32_9 : i32 to index
    %c0_10 = arith.constant 0 : index
    %c0_11 = arith.constant 0 : index
    %14 = vector.load %arg5[%13, %c0_10, %c0_11] : memref<8x8x16xf32, #tpu.memory_space<vmem>>, vector<1x8x16xf32>
    %15 = vector.shape_cast %14 : vector<1x8x16xf32> to vector<8x16xf32>
    %cst_12 = arith.constant dense<0.000000e+00> : vector<8x256xf32>
    %16 = tpu.matmul %15, %4, %cst_12 {dimension_numbers = #tpu.dot_dimension_numbers<[1], [0], [0], [1], [0, 0, 1, 1], [], []>} : vector<8x16xf32>, vector<16x256xf32>, vector<8x256xf32> -> vector<8x256xf32>
    %17 = vector.broadcast %5 : vector<1x256xf32> to vector<8x256xf32>
    %18 = arith.addf %16, %17 : vector<8x256xf32>
    %cst_13 = arith.constant dense<0.000000e+00> : vector<8x256xf32>
    %19 = tpu.matmul %12, %3, %cst_13 {dimension_numbers = #tpu.dot_dimension_numbers<[1], [0], [0], [1], [0, 0, 1, 1], [], []>} : vector<8x128xf32>, vector<128x256xf32>, vector<8x256xf32> -> vector<8x256xf32>
    %20 = arith.addf %19, %18 : vector<8x256xf32>
    %21 = vector.broadcast %11 : vector<1x256xf32> to vector<8x256xf32>
    %22 = arith.mulf %20, %21 : vector<8x256xf32>
    %23 = math.tanh %22 : vector<8x256xf32>
    %24 = vector.extract_strided_slice %23 {offsets = [0, 0], sizes = [8, 128], strides = [1, 1]} : vector<8x256xf32> to vector<8x128xf32>
    %cst_14 = arith.constant 1.000000e+00 : f32
    %25 = vector.broadcast %cst_14 : f32 to vector<8x128xf32>
    %26 = arith.addf %24, %25 : vector<8x128xf32>
    %cst_15 = arith.constant 5.000000e-01 : f32
    %27 = vector.broadcast %cst_15 : f32 to vector<8x128xf32>
    %28 = arith.mulf %27, %26 : vector<8x128xf32>
    %29 = vector.extract_strided_slice %23 {offsets = [0, 128], sizes = [8, 128], strides = [1, 1]} : vector<8x256xf32> to vector<8x128xf32>
    %30 = arith.subf %12, %29 : vector<8x128xf32>
    %31 = arith.mulf %28, %30 : vector<8x128xf32>
    %32 = arith.addf %29, %31 : vector<8x128xf32>
    %c1_i32 = arith.constant 1 : i32
    %33 = arith.index_cast %c1_i32 : i32 to index
    %c0_16 = arith.constant 0 : index
    %c0_17 = arith.constant 0 : index
    %34 = vector.load %arg5[%33, %c0_16, %c0_17] : memref<8x8x16xf32, #tpu.memory_space<vmem>>, vector<1x8x16xf32>
    %35 = vector.shape_cast %34 : vector<1x8x16xf32> to vector<8x16xf32>
    %cst_18 = arith.constant dense<0.000000e+00> : vector<8x256xf32>
    %36 = tpu.matmul %35, %4, %cst_18 {dimension_numbers = #tpu.dot_dimension_numbers<[1], [0], [0], [1], [0, 0, 1, 1], [], []>} : vector<8x16xf32>, vector<16x256xf32>, vector<8x256xf32> -> vector<8x256xf32>
    %37 = vector.broadcast %5 : vector<1x256xf32> to vector<8x256xf32>
    %38 = arith.addf %36, %37 : vector<8x256xf32>
    %cst_19 = arith.constant dense<0.000000e+00> : vector<8x256xf32>
    %39 = tpu.matmul %32, %3, %cst_19 {dimension_numbers = #tpu.dot_dimension_numbers<[1], [0], [0], [1], [0, 0, 1, 1], [], []>} : vector<8x128xf32>, vector<128x256xf32>, vector<8x256xf32> -> vector<8x256xf32>
    %40 = arith.addf %39, %38 : vector<8x256xf32>
    %41 = vector.broadcast %11 : vector<1x256xf32> to vector<8x256xf32>
    %42 = arith.mulf %40, %41 : vector<8x256xf32>
    %43 = math.tanh %42 : vector<8x256xf32>
    %44 = vector.extract_strided_slice %43 {offsets = [0, 0], sizes = [8, 128], strides = [1, 1]} : vector<8x256xf32> to vector<8x128xf32>
    %cst_20 = arith.constant 1.000000e+00 : f32
    %45 = vector.broadcast %cst_20 : f32 to vector<8x128xf32>
    %46 = arith.addf %44, %45 : vector<8x128xf32>
    %cst_21 = arith.constant 5.000000e-01 : f32
    %47 = vector.broadcast %cst_21 : f32 to vector<8x128xf32>
    %48 = arith.mulf %47, %46 : vector<8x128xf32>
    %49 = vector.extract_strided_slice %43 {offsets = [0, 128], sizes = [8, 128], strides = [1, 1]} : vector<8x256xf32> to vector<8x128xf32>
    %50 = arith.subf %32, %49 : vector<8x128xf32>
    %51 = arith.mulf %48, %50 : vector<8x128xf32>
    %52 = arith.addf %49, %51 : vector<8x128xf32>
    %c2_i32 = arith.constant 2 : i32
    %53 = arith.index_cast %c2_i32 : i32 to index
    %c0_22 = arith.constant 0 : index
    %c0_23 = arith.constant 0 : index
    %54 = vector.load %arg5[%53, %c0_22, %c0_23] : memref<8x8x16xf32, #tpu.memory_space<vmem>>, vector<1x8x16xf32>
    %55 = vector.shape_cast %54 : vector<1x8x16xf32> to vector<8x16xf32>
    %cst_24 = arith.constant dense<0.000000e+00> : vector<8x256xf32>
    %56 = tpu.matmul %55, %4, %cst_24 {dimension_numbers = #tpu.dot_dimension_numbers<[1], [0], [0], [1], [0, 0, 1, 1], [], []>} : vector<8x16xf32>, vector<16x256xf32>, vector<8x256xf32> -> vector<8x256xf32>
    %57 = vector.broadcast %5 : vector<1x256xf32> to vector<8x256xf32>
    %58 = arith.addf %56, %57 : vector<8x256xf32>
    %cst_25 = arith.constant dense<0.000000e+00> : vector<8x256xf32>
    %59 = tpu.matmul %52, %3, %cst_25 {dimension_numbers = #tpu.dot_dimension_numbers<[1], [0], [0], [1], [0, 0, 1, 1], [], []>} : vector<8x128xf32>, vector<128x256xf32>, vector<8x256xf32> -> vector<8x256xf32>
    %60 = arith.addf %59, %58 : vector<8x256xf32>
    %61 = vector.broadcast %11 : vector<1x256xf32> to vector<8x256xf32>
    %62 = arith.mulf %60, %61 : vector<8x256xf32>
    %63 = math.tanh %62 : vector<8x256xf32>
    %64 = vector.extract_strided_slice %63 {offsets = [0, 0], sizes = [8, 128], strides = [1, 1]} : vector<8x256xf32> to vector<8x128xf32>
    %cst_26 = arith.constant 1.000000e+00 : f32
    %65 = vector.broadcast %cst_26 : f32 to vector<8x128xf32>
    %66 = arith.addf %64, %65 : vector<8x128xf32>
    %cst_27 = arith.constant 5.000000e-01 : f32
    %67 = vector.broadcast %cst_27 : f32 to vector<8x128xf32>
    %68 = arith.mulf %67, %66 : vector<8x128xf32>
    %69 = vector.extract_strided_slice %63 {offsets = [0, 128], sizes = [8, 128], strides = [1, 1]} : vector<8x256xf32> to vector<8x128xf32>
    %70 = arith.subf %52, %69 : vector<8x128xf32>
    %71 = arith.mulf %68, %70 : vector<8x128xf32>
    %72 = arith.addf %69, %71 : vector<8x128xf32>
    %c3_i32 = arith.constant 3 : i32
    %73 = arith.index_cast %c3_i32 : i32 to index
    %c0_28 = arith.constant 0 : index
    %c0_29 = arith.constant 0 : index
    %74 = vector.load %arg5[%73, %c0_28, %c0_29] : memref<8x8x16xf32, #tpu.memory_space<vmem>>, vector<1x8x16xf32>
    %75 = vector.shape_cast %74 : vector<1x8x16xf32> to vector<8x16xf32>
    %cst_30 = arith.constant dense<0.000000e+00> : vector<8x256xf32>
    %76 = tpu.matmul %75, %4, %cst_30 {dimension_numbers = #tpu.dot_dimension_numbers<[1], [0], [0], [1], [0, 0, 1, 1], [], []>} : vector<8x16xf32>, vector<16x256xf32>, vector<8x256xf32> -> vector<8x256xf32>
    %77 = vector.broadcast %5 : vector<1x256xf32> to vector<8x256xf32>
    %78 = arith.addf %76, %77 : vector<8x256xf32>
    %cst_31 = arith.constant dense<0.000000e+00> : vector<8x256xf32>
    %79 = tpu.matmul %72, %3, %cst_31 {dimension_numbers = #tpu.dot_dimension_numbers<[1], [0], [0], [1], [0, 0, 1, 1], [], []>} : vector<8x128xf32>, vector<128x256xf32>, vector<8x256xf32> -> vector<8x256xf32>
    %80 = arith.addf %79, %78 : vector<8x256xf32>
    %81 = vector.broadcast %11 : vector<1x256xf32> to vector<8x256xf32>
    %82 = arith.mulf %80, %81 : vector<8x256xf32>
    %83 = math.tanh %82 : vector<8x256xf32>
    %84 = vector.extract_strided_slice %83 {offsets = [0, 0], sizes = [8, 128], strides = [1, 1]} : vector<8x256xf32> to vector<8x128xf32>
    %cst_32 = arith.constant 1.000000e+00 : f32
    %85 = vector.broadcast %cst_32 : f32 to vector<8x128xf32>
    %86 = arith.addf %84, %85 : vector<8x128xf32>
    %cst_33 = arith.constant 5.000000e-01 : f32
    %87 = vector.broadcast %cst_33 : f32 to vector<8x128xf32>
    %88 = arith.mulf %87, %86 : vector<8x128xf32>
    %89 = vector.extract_strided_slice %83 {offsets = [0, 128], sizes = [8, 128], strides = [1, 1]} : vector<8x256xf32> to vector<8x128xf32>
    %90 = arith.subf %72, %89 : vector<8x128xf32>
    %91 = arith.mulf %88, %90 : vector<8x128xf32>
    %92 = arith.addf %89, %91 : vector<8x128xf32>
    %c4_i32 = arith.constant 4 : i32
    %93 = arith.index_cast %c4_i32 : i32 to index
    %c0_34 = arith.constant 0 : index
    %c0_35 = arith.constant 0 : index
    %94 = vector.load %arg5[%93, %c0_34, %c0_35] : memref<8x8x16xf32, #tpu.memory_space<vmem>>, vector<1x8x16xf32>
    %95 = vector.shape_cast %94 : vector<1x8x16xf32> to vector<8x16xf32>
    %cst_36 = arith.constant dense<0.000000e+00> : vector<8x256xf32>
    %96 = tpu.matmul %95, %4, %cst_36 {dimension_numbers = #tpu.dot_dimension_numbers<[1], [0], [0], [1], [0, 0, 1, 1], [], []>} : vector<8x16xf32>, vector<16x256xf32>, vector<8x256xf32> -> vector<8x256xf32>
    %97 = vector.broadcast %5 : vector<1x256xf32> to vector<8x256xf32>
    %98 = arith.addf %96, %97 : vector<8x256xf32>
    %cst_37 = arith.constant dense<0.000000e+00> : vector<8x256xf32>
    %99 = tpu.matmul %92, %3, %cst_37 {dimension_numbers = #tpu.dot_dimension_numbers<[1], [0], [0], [1], [0, 0, 1, 1], [], []>} : vector<8x128xf32>, vector<128x256xf32>, vector<8x256xf32> -> vector<8x256xf32>
    %100 = arith.addf %99, %98 : vector<8x256xf32>
    %101 = vector.broadcast %11 : vector<1x256xf32> to vector<8x256xf32>
    %102 = arith.mulf %100, %101 : vector<8x256xf32>
    %103 = math.tanh %102 : vector<8x256xf32>
    %104 = vector.extract_strided_slice %103 {offsets = [0, 0], sizes = [8, 128], strides = [1, 1]} : vector<8x256xf32> to vector<8x128xf32>
    %cst_38 = arith.constant 1.000000e+00 : f32
    %105 = vector.broadcast %cst_38 : f32 to vector<8x128xf32>
    %106 = arith.addf %104, %105 : vector<8x128xf32>
    %cst_39 = arith.constant 5.000000e-01 : f32
    %107 = vector.broadcast %cst_39 : f32 to vector<8x128xf32>
    %108 = arith.mulf %107, %106 : vector<8x128xf32>
    %109 = vector.extract_strided_slice %103 {offsets = [0, 128], sizes = [8, 128], strides = [1, 1]} : vector<8x256xf32> to vector<8x128xf32>
    %110 = arith.subf %92, %109 : vector<8x128xf32>
    %111 = arith.mulf %108, %110 : vector<8x128xf32>
    %112 = arith.addf %109, %111 : vector<8x128xf32>
    %c5_i32 = arith.constant 5 : i32
    %113 = arith.index_cast %c5_i32 : i32 to index
    %c0_40 = arith.constant 0 : index
    %c0_41 = arith.constant 0 : index
    %114 = vector.load %arg5[%113, %c0_40, %c0_41] : memref<8x8x16xf32, #tpu.memory_space<vmem>>, vector<1x8x16xf32>
    %115 = vector.shape_cast %114 : vector<1x8x16xf32> to vector<8x16xf32>
    %cst_42 = arith.constant dense<0.000000e+00> : vector<8x256xf32>
    %116 = tpu.matmul %115, %4, %cst_42 {dimension_numbers = #tpu.dot_dimension_numbers<[1], [0], [0], [1], [0, 0, 1, 1], [], []>} : vector<8x16xf32>, vector<16x256xf32>, vector<8x256xf32> -> vector<8x256xf32>
    %117 = vector.broadcast %5 : vector<1x256xf32> to vector<8x256xf32>
    %118 = arith.addf %116, %117 : vector<8x256xf32>
    %cst_43 = arith.constant dense<0.000000e+00> : vector<8x256xf32>
    %119 = tpu.matmul %112, %3, %cst_43 {dimension_numbers = #tpu.dot_dimension_numbers<[1], [0], [0], [1], [0, 0, 1, 1], [], []>} : vector<8x128xf32>, vector<128x256xf32>, vector<8x256xf32> -> vector<8x256xf32>
    %120 = arith.addf %119, %118 : vector<8x256xf32>
    %121 = vector.broadcast %11 : vector<1x256xf32> to vector<8x256xf32>
    %122 = arith.mulf %120, %121 : vector<8x256xf32>
    %123 = math.tanh %122 : vector<8x256xf32>
    %124 = vector.extract_strided_slice %123 {offsets = [0, 0], sizes = [8, 128], strides = [1, 1]} : vector<8x256xf32> to vector<8x128xf32>
    %cst_44 = arith.constant 1.000000e+00 : f32
    %125 = vector.broadcast %cst_44 : f32 to vector<8x128xf32>
    %126 = arith.addf %124, %125 : vector<8x128xf32>
    %cst_45 = arith.constant 5.000000e-01 : f32
    %127 = vector.broadcast %cst_45 : f32 to vector<8x128xf32>
    %128 = arith.mulf %127, %126 : vector<8x128xf32>
    %129 = vector.extract_strided_slice %123 {offsets = [0, 128], sizes = [8, 128], strides = [1, 1]} : vector<8x256xf32> to vector<8x128xf32>
    %130 = arith.subf %112, %129 : vector<8x128xf32>
    %131 = arith.mulf %128, %130 : vector<8x128xf32>
    %132 = arith.addf %129, %131 : vector<8x128xf32>
    %c6_i32 = arith.constant 6 : i32
    %133 = arith.index_cast %c6_i32 : i32 to index
    %c0_46 = arith.constant 0 : index
    %c0_47 = arith.constant 0 : index
    %134 = vector.load %arg5[%133, %c0_46, %c0_47] : memref<8x8x16xf32, #tpu.memory_space<vmem>>, vector<1x8x16xf32>
    %135 = vector.shape_cast %134 : vector<1x8x16xf32> to vector<8x16xf32>
    %cst_48 = arith.constant dense<0.000000e+00> : vector<8x256xf32>
    %136 = tpu.matmul %135, %4, %cst_48 {dimension_numbers = #tpu.dot_dimension_numbers<[1], [0], [0], [1], [0, 0, 1, 1], [], []>} : vector<8x16xf32>, vector<16x256xf32>, vector<8x256xf32> -> vector<8x256xf32>
    %137 = vector.broadcast %5 : vector<1x256xf32> to vector<8x256xf32>
    %138 = arith.addf %136, %137 : vector<8x256xf32>
    %cst_49 = arith.constant dense<0.000000e+00> : vector<8x256xf32>
    %139 = tpu.matmul %132, %3, %cst_49 {dimension_numbers = #tpu.dot_dimension_numbers<[1], [0], [0], [1], [0, 0, 1, 1], [], []>} : vector<8x128xf32>, vector<128x256xf32>, vector<8x256xf32> -> vector<8x256xf32>
    %140 = arith.addf %139, %138 : vector<8x256xf32>
    %141 = vector.broadcast %11 : vector<1x256xf32> to vector<8x256xf32>
    %142 = arith.mulf %140, %141 : vector<8x256xf32>
    %143 = math.tanh %142 : vector<8x256xf32>
    %144 = vector.extract_strided_slice %143 {offsets = [0, 0], sizes = [8, 128], strides = [1, 1]} : vector<8x256xf32> to vector<8x128xf32>
    %cst_50 = arith.constant 1.000000e+00 : f32
    %145 = vector.broadcast %cst_50 : f32 to vector<8x128xf32>
    %146 = arith.addf %144, %145 : vector<8x128xf32>
    %cst_51 = arith.constant 5.000000e-01 : f32
    %147 = vector.broadcast %cst_51 : f32 to vector<8x128xf32>
    %148 = arith.mulf %147, %146 : vector<8x128xf32>
    %149 = vector.extract_strided_slice %143 {offsets = [0, 128], sizes = [8, 128], strides = [1, 1]} : vector<8x256xf32> to vector<8x128xf32>
    %150 = arith.subf %132, %149 : vector<8x128xf32>
    %151 = arith.mulf %148, %150 : vector<8x128xf32>
    %152 = arith.addf %149, %151 : vector<8x128xf32>
    %c7_i32 = arith.constant 7 : i32
    %153 = arith.index_cast %c7_i32 : i32 to index
    %c0_52 = arith.constant 0 : index
    %c0_53 = arith.constant 0 : index
    %154 = vector.load %arg5[%153, %c0_52, %c0_53] : memref<8x8x16xf32, #tpu.memory_space<vmem>>, vector<1x8x16xf32>
    %155 = vector.shape_cast %154 : vector<1x8x16xf32> to vector<8x16xf32>
    %cst_54 = arith.constant dense<0.000000e+00> : vector<8x256xf32>
    %156 = tpu.matmul %155, %4, %cst_54 {dimension_numbers = #tpu.dot_dimension_numbers<[1], [0], [0], [1], [0, 0, 1, 1], [], []>} : vector<8x16xf32>, vector<16x256xf32>, vector<8x256xf32> -> vector<8x256xf32>
    %157 = vector.broadcast %5 : vector<1x256xf32> to vector<8x256xf32>
    %158 = arith.addf %156, %157 : vector<8x256xf32>
    %cst_55 = arith.constant dense<0.000000e+00> : vector<8x256xf32>
    %159 = tpu.matmul %152, %3, %cst_55 {dimension_numbers = #tpu.dot_dimension_numbers<[1], [0], [0], [1], [0, 0, 1, 1], [], []>} : vector<8x128xf32>, vector<128x256xf32>, vector<8x256xf32> -> vector<8x256xf32>
    %160 = arith.addf %159, %158 : vector<8x256xf32>
    %161 = vector.broadcast %11 : vector<1x256xf32> to vector<8x256xf32>
    %162 = arith.mulf %160, %161 : vector<8x256xf32>
    %163 = math.tanh %162 : vector<8x256xf32>
    %164 = vector.extract_strided_slice %163 {offsets = [0, 0], sizes = [8, 128], strides = [1, 1]} : vector<8x256xf32> to vector<8x128xf32>
    %cst_56 = arith.constant 1.000000e+00 : f32
    %165 = vector.broadcast %cst_56 : f32 to vector<8x128xf32>
    %166 = arith.addf %164, %165 : vector<8x128xf32>
    %cst_57 = arith.constant 5.000000e-01 : f32
    %167 = vector.broadcast %cst_57 : f32 to vector<8x128xf32>
    %168 = arith.mulf %167, %166 : vector<8x128xf32>
    %169 = vector.extract_strided_slice %163 {offsets = [0, 128], sizes = [8, 128], strides = [1, 1]} : vector<8x256xf32> to vector<8x128xf32>
    %170 = arith.subf %152, %169 : vector<8x128xf32>
    %171 = arith.mulf %168, %170 : vector<8x128xf32>
    %172 = arith.addf %169, %171 : vector<8x128xf32>
    %c8_i32 = arith.constant 8 : i32
    %c0_58 = arith.constant 0 : index
    %c0_59 = arith.constant 0 : index
    %173 = vector.load %arg6[%c0_58, %c0_59] : memref<8x128xf32, #tpu.memory_space<vmem>>, vector<8x128xf32>
    tpu.vector_store %arg6[%c0_58, %c0_59], %172 {strides = array<i32>} : memref<8x128xf32, #tpu.memory_space<vmem>>, vector<8x128xf32>,
    return
  }
  func.func @transform_0(%arg0: i32, %arg1: i32) -> (i32, i32) {
    %c0_i32 = arith.constant 0 : i32
    %c0_i32_0 = arith.constant 0 : i32
    %c0_i32_1 = arith.constant 0 : i32
    return %c0_i32, %c0_i32_0 : i32, i32
  }
  func.func @transform_1(%arg0: i32, %arg1: i32) -> (i32, i32) {
    %c0_i32 = arith.constant 0 : i32
    %c0_i32_0 = arith.constant 0 : i32
    %c0_i32_1 = arith.constant 0 : i32
    return %c0_i32, %c0_i32_0 : i32, i32
  }
  func.func @transform_2(%arg0: i32, %arg1: i32) -> (i32, i32) {
    %c0_i32 = arith.constant 0 : i32
    %c0_i32_0 = arith.constant 0 : i32
    %c0_i32_1 = arith.constant 0 : i32
    return %c0_i32, %c0_i32_0 : i32, i32
  }
  func.func @transform_3(%arg0: i32, %arg1: i32) -> (i32, i32, i32) {
    %c0_i32 = arith.constant 0 : i32
    %c0_i32_0 = arith.constant 0 : i32
    return %arg1, %arg0, %c0_i32 : i32, i32, i32
  }
  func.func @transform_4(%arg0: i32, %arg1: i32) -> (i32, i32) {
    %c0_i32 = arith.constant 0 : i32
    %c0_i32_0 = arith.constant 0 : i32
    return %arg0, %c0_i32 : i32, i32
  }
}

</mosaic_0001>

<bundles_post_ra>
// kernel: tpu_custom_call.1
= control target key start
LH: loop header
LB: loop body
LE: loop exit
PB: predicated region body
PF: predicated region fallthrough
CT: control target
= control target key end

     0   :  { %9 = vsyncpa [#allocation3], 0  ;;  %s2165_s0 = inlined_call_operand.hbm [shape: f32[16,256], index: 0, kind: input, shape index: {}]   ;;  %s2166_s1 = inlined_call_operand.vmem [shape: f32[1,256], index: 1, kind: input, shape index: {}]   ;;  %s2167_s2 = inlined_call_operand.hbm [shape: f32[128,256], index: 2, kind: input, shape index: {}]   ;;  %s2168_s3 = inlined_call_operand.hbm [shape: f32[8,8,16], index: 3, kind: input, shape index: {}]   ;;  %s2169_s4 = inlined_call_operand.hbm [shape: f32[8,128], index: 4, kind: output, shape index: {}]  }
   0x1   :  { %10 = vsyncpa [#allocation6], 0 }
   0x2   :  { %11 = vsyncpa [#allocation4], 0  ;;  %s1848_s15 = smov [#allocation5]   ;;  %s1849_s17 = smov [#allocation2]  }
   0x3   :  { %s31_s16 = sshll.u32 %s1848_s15, 4  ;;  %s17_s18 = sshll.u32 %s1849_s17, 4  ;;  %s32_s16 = int_to_ptr.vmem [resolvable:$true] %s31_s16  ;;  %s1882_s18 = int_to_ptr.vmem [resolvable:$true] %s17_s18 }
   0x4   :  { %s1754_s21 = scalar_lea.hbm %s2167_s2, 4096 }
   0x5   :  { %p1755_p0 = scmp.ne.s32.totalorder %s2167_s2, %s1754_s21  ;;  %p1758_p1 = scmp.lt.u32.totalorder %s1754_s21, %s2167_s2 }
   0x7   :  { %p1760_p2 = pnand %p1758_p1, %p1755_p0 }
   0x9   :  { %1763 = shalt.err (!%p1760_p2)
}
   0xa   :  { %s1764_s26 = scalar_lea.vmem %s32_s16, 4096  ;;  %p1769_p4 = scmp.lt.s32.totalorder %s32_s16, %s32_s16 }
   0xb   :  { %p1765_p3 = scmp.ne.s32.totalorder %s32_s16, %s1764_s26  ;;  %p1770_p5 = scmp.lt.s32.totalorder %s1764_s26, %s1764_s26 }
   0xd   :  { %p1771_p6 = por %p1770_p5, %p1769_p4 }
   0xf   :  { %p1772_p7 = pnand %p1771_p6, %p1765_p3 }
  0x11   :  { %1775 = shalt.err (!%p1772_p7)
}
  0x12   :  { %s1850_s27 = smov 256   ;;  %s1851_s28 = smov 16  }
  0x13   :  { %37 = dma.hbm_to_vmem [thread:$0]  %s2167_s2, 4096, %s32_s16, [#allocation6], %s1850_s27, %s1850_s27, %s1851_s28  }
  0x14   :  { %s1776_s7 = scalar_lea.hbm %s2165_s0, 512 }
  0x15   :  { %p1777_p8 = scmp.ne.s32.totalorder %s2165_s0, %s1776_s7  ;;  %p1780_p9 = scmp.lt.u32.totalorder %s1776_s7, %s2165_s0 }
  0x17   :  { %p1782_p10 = pnand %p1780_p9, %p1777_p8 }
  0x19   :  { %1785 = shalt.err (!%p1782_p10)
}
  0x1a   :  { %s1786_s12 = scalar_lea.vmem %s1882_s18, 512  ;;  %p1791_p12 = scmp.lt.s32.totalorder %s1882_s18, %s1882_s18 }
  0x1b   :  { %p1787_p11 = scmp.ne.s32.totalorder %s1882_s18, %s1786_s12  ;;  %p1792_p13 = scmp.lt.s32.totalorder %s1786_s12, %s1786_s12 }
  0x1d   :  { %p1793_p0 = por %p1792_p13, %p1791_p12 }
  0x1f   :  { %p1794_p1 = pnand %p1793_p0, %p1787_p11 }
  0x21   :  { %1797 = shalt.err (!%p1794_p1)
}
  0x22   :  { %23 = dma.hbm_to_vmem [thread:$0]  %s2165_s0, 512, %s1882_s18, [#allocation3], %s1850_s27, %s1850_s27, %s1851_s28  }
  0x23   :  { %s1852_s14 = smov [#allocation7]   ;;  %s1798_s19 = scalar_lea.hbm %s2168_s3, 1024 }
  0x24   :  { %s43_s15 = sshll.u32 %s1852_s14, 4  ;;  %p1799_p2 = scmp.ne.s32.totalorder %s2168_s3, %s1798_s19  ;;  %s44_s15 = int_to_ptr.vmem [resolvable:$true] %s43_s15 }
  0x25   :  { %p1802_p3 = scmp.lt.u32.totalorder %s1798_s19, %s2168_s3 }
  0x27   :  { %p1804_p4 = pnand %p1802_p3, %p1799_p2 }
  0x29   :  { %1807 = shalt.err (!%p1804_p4)
}
  0x2a   :  { %s1808_s24 = scalar_lea.vmem %s44_s15, 1024  ;;  %p1813_p6 = scmp.lt.s32.totalorder %s44_s15, %s44_s15 }
  0x2b   :  { %p1809_p5 = scmp.ne.s32.totalorder %s44_s15, %s1808_s24  ;;  %p1814_p7 = scmp.lt.s32.totalorder %s1808_s24, %s1808_s24 }
  0x2d   :  { %p1815_p8 = por %p1814_p7, %p1813_p6 }
  0x2f   :  { %p1816_p9 = pnand %p1815_p8, %p1809_p5 }
  0x31   :  { %1819 = shalt.err (!%p1816_p9)
}
  0x32   :  { %s1853_s0 = smov 128   ;;  %s1854_s18 = smov 8  }
  0x33   :  { %49 = dma.hbm_to_vmem [thread:$0]  %s2168_s3, 1024, %s44_s15, [#allocation6], %s1853_s0, %s1853_s0, %s1854_s18  }
  0x34   :  { %1842 = dma.done.wait [#allocation3], 512  }
  0x35   :  { %1843 = vsyncadd [#allocation3], 4294966784 }
  0x36   :  { %1844 = dma.done.wait [#allocation6], 5120  }
  0x37   :  { %1845 = vsyncadd [#allocation6], 4294962176  ;;  %v1855_v0 = vmov 0.0   ;;  %v97_v1 = vld [vmem:[#allocation2 + $0x8] sm:$0xff]  ;;  %v99_v2 = vld [vmem:[#allocation2 + $0x18] sm:$0xff]  ;;  %vm121_vm0 = vcmask 130048   ;;  %v111_v58 = vlaneseq }
  0x38   :  { %189 = vmatprep.mubr.f32.mxu0 %v1855_v0  ;;  %345 = vmatprep.mubr.f32.mxu1 %v1855_v0  ;;  %v96_v3 = vld [vmem:[#allocation2] sm:$0xff]  ;;  %v1927_v4 = vpack.c.bf16 %v99_v2, %v97_v1  ;;  %v98_v5 = vld [vmem:[#allocation2 + $0x10] sm:$0xff]  ;;  %v65_v6 = vld [vmem:[#allocation5 + $0x8] sm:$0xff] }
  0x39   :  { %v67_v7 = vld [vmem:[#allocation5 + $0x18] sm:$0xff]  ;;  %v1929_v8 = vpack.c.bf16 %v98_v5, %v96_v3  ;;  %v64_v10 = vld [vmem:[#allocation5] sm:$0xff]  ;;  %v66_v11 = vld [vmem:[#allocation5 + $0x10] sm:$0xff]  ;;  %v112_v59 = vshrl.u32 %v111_v58, 7 }
  0x3a   :  { %v1931_v9 = vpack.c.bf16 %v67_v7, %v65_v6  ;;  %1394 = vmatprep.subr.bf16.mxu0 %v1927_v4  ;;  %v69_v12 = vld [vmem:[#allocation5 + $0x28] sm:$0xff]  ;;  %v71_v13 = vld [vmem:[#allocation5 + $0x38] sm:$0xff]  ;;  %1430 = vmatprep.subr.bf16.mxu1 %v1927_v4  ;;  %v109_v14 = vld [vmem:[#allocation7] sm:$0xff]  ;;  %v1936_v15 = vpack.c.bf16 %v66_v11, %v64_v10 }
  0x3b   :  { %1396 = vmatpush1.bf16.msra.mxu0 %v1929_v8  ;;  %1432 = vmatpush1.bf16.msra.mxu1 %v1929_v8  ;;  %v1940_v16 = vpack.c.bf16 %v71_v13, %v69_v12  ;;  %v68_v17 = vld [vmem:[#allocation5 + $0x20] sm:$0xff]  ;;  %v70_v18 = vld [vmem:[#allocation5 + $0x30] sm:$0xff]  ;;  %v73_v19 = vld [vmem:[#allocation5 + $0x48] sm:$0xff]  ;;  %v113_v60 = vsub.s32 0, %v112_v59  ;;  %v117_v62 = vsub.s32 1, %v112_v59 }
  0x3c   :  { %1398 = vmatprep.subr.bf16.mxu0 %v1931_v9  ;;  %1434 = vmatprep.subr.bf16.mxu1 %v1931_v9  ;;  %v75_v20 = vld [vmem:[#allocation5 + $0x58] sm:$0xff]  ;;  %v1945_v21 = vpack.c.bf16 %v70_v18, %v68_v17  ;;  %v72_v23 = vld [vmem:[#allocation5 + $0x40] sm:$0xff]  ;;  %v74_v24 = vld [vmem:[#allocation5 + $0x50] sm:$0xff] }
  0x3d   :  { %v1949_v22 = vpack.c.bf16 %v75_v20, %v73_v19  ;;  %v77_v25 = vld [vmem:[#allocation5 + $0x68] sm:$0xff]  ;;  %v79_v26 = vld [vmem:[#allocation5 + $0x78] sm:$0xff]  ;;  %v1952_v27 = vpack.c.bf16 %v74_v24, %v72_v23  ;;  %v76_v30 = vld [vmem:[#allocation5 + $0x60] sm:$0xff] }
  0x3e   :  { %1385 = vmatmul.mubr.msk.f32.vlgmr.msra.gmra.mrb[0].mxu0 %vm121_vm0, %v109_v14  ;;  %v277_v28 = vld [vmem:[#allocation7 + $0x8] sm:$0xff]  ;;  %v1955_v29 = vpack.c.bf16 %v79_v26, %v77_v25  ;;  %v78_v31 = vld [vmem:[#allocation5 + $0x70] sm:$0xff]  ;;  %v83_v33 = vld [vmem:[#allocation5 + $0x98] sm:$0xff] }
  0x3f   :  { %1400 = vmatpush1.bf16.msra.mxu0 %v1936_v15  ;;  %260 = vmatprep.mubr.f32.mxu0 %v1855_v0  ;;  %v81_v32 = vld [vmem:[#allocation5 + $0x88] sm:$0xff]  ;;  %v1962_v34 = vpack.c.bf16 %v78_v31, %v76_v30  ;;  %v80_v36 = vld [vmem:[#allocation5 + $0x80] sm:$0xff]  ;;  %v82_v37 = vld [vmem:[#allocation5 + $0x90] sm:$0xff] }
  0x40   :  { %1402 = vmatprep.subr.bf16.mxu0 %v1940_v16  ;;  %1386 = vmatmul.mubr.msk.f32.vlgmr.msra.gmra.mrb[0].mxu1 %vm121_vm0, %v277_v28  ;;  %v1965_v35 = vpack.c.bf16 %v83_v33, %v81_v32  ;;  %v85_v38 = vld [vmem:[#allocation5 + $0xa8] sm:$0xff]  ;;  %v87_v39 = vld [vmem:[#allocation5 + $0xb8] sm:$0xff]  ;;  %v1970_v40 = vpack.c.bf16 %v82_v37, %v80_v36  ;;  %v84_v42 = vld [vmem:[#allocation5 + $0xa0] sm:$0xff] }
  0x41   :  { %1436 = vmatpush1.bf16.msra.mxu1 %v1936_v15  ;;  %416 = vmatprep.mubr.f32.mxu1 %v1855_v0  ;;  %v1973_v41 = vpack.c.bf16 %v87_v39, %v85_v38  ;;  %v86_v43 = vld [vmem:[#allocation5 + $0xb0] sm:$0xff]  ;;  %v89_v44 = vld [vmem:[#allocation5 + $0xc8] sm:$0xff]  ;;  %v91_v45 = vld [vmem:[#allocation5 + $0xd8] sm:$0xff] }
  0x42   :  { %1438 = vmatprep.subr.bf16.mxu1 %v1940_v16  ;;  %v1978_v46 = vpack.c.bf16 %v86_v43, %v84_v42  ;;  %v1981_v47 = vpack.c.bf16 %v91_v45, %v89_v44  ;;  %v88_v48 = vld [vmem:[#allocation5 + $0xc0] sm:$0xff]  ;;  %v90_v49 = vld [vmem:[#allocation5 + $0xd0] sm:$0xff]  ;;  %v93_v50 = vld [vmem:[#allocation5 + $0xe8] sm:$0xff] }
  0x43   :  { %1404 = vmatpush1.bf16.msra.mxu0 %v1945_v21  ;;  %v95_v51 = vld [vmem:[#allocation5 + $0xf8] sm:$0xff]  ;;  %v1986_v52 = vpack.c.bf16 %v90_v49, %v88_v48  ;;  %v92_v54 = vld [vmem:[#allocation5 + $0xe0] sm:$0xff]  ;;  %v94_v55 = vld [vmem:[#allocation5 + $0xf0] sm:$0xff] }
  0x44   :  { %1406 = vmatprep.subr.bf16.mxu0 %v1949_v22  ;;  %v1989_v53 = vpack.c.bf16 %v95_v51, %v93_v50  ;;  %v1994_v56 = vpack.c.bf16 %v94_v55, %v92_v54  ;;  %v433_v57 = vld [vmem:[#allocation7 + $0x10] sm:$0xff]  ;;  %v100_v61 = vld [vmem:[%s2166_s1] sm:$0x3]  ;;  %v589_v19 = vld [vmem:[#allocation7 + $0x18] sm:$0xff]  ;;  %s1856_s1 = smov [#allocation8]  }
  0x45   :  { %1440 = vmatpush1.bf16.msra.mxu1 %v1945_v21  ;;  %v2030_v63 = vrot.slane %v100_v61, %v113_v60  ;;  %v2032_v1 = vrot.slane %v100_v61, %v117_v62  ;;  %v745_v38 = vld [vmem:[#allocation7 + $0x20] sm:$0xff]  ;;  %v901_v58 = vld [vmem:[#allocation7 + $0x28] sm:$0xff]  ;;  %s1375_s28 = sshll.u32 %s1856_s1, 4  ;;  %s1376_s28 = int_to_ptr.vmem [resolvable:$true] %s1375_s28 }
  0x46   :  { %1442 = vmatprep.subr.bf16.mxu1 %v1949_v22  ;;  %s1820_s29 = scalar_lea.vmem %s1376_s28, 128  ;;  %p1825_p11 = scmp.lt.s32.totalorder %s1376_s28, %s1376_s28 }
  0x47   :  { %1408 = vmatpush1.bf16.msra.mxu0 %v1952_v27  ;;  %p1821_p10 = scmp.ne.s32.totalorder %s1376_s28, %s1820_s29  ;;  %p1826_p12 = scmp.lt.s32.totalorder %s1820_s29, %s1820_s29 }
  0x48   :  { %1410 = vmatprep.subr.bf16.mxu0 %v1955_v29 }
  0x49   :  { %1444 = vmatpush1.bf16.msra.mxu1 %v1952_v27  ;;  %p1827_p13 = por %p1826_p12, %p1825_p11 }
  0x4a   :  { %1446 = vmatprep.subr.bf16.mxu1 %v1955_v29 }
  0x4b   :  { %1412 = vmatpush1.bf16.msra.mxu0 %v1962_v34  ;;  %p1828_p0 = pnand %p1827_p13, %p1821_p10 }
  0x4c   :  { %1414 = vmatprep.subr.bf16.mxu0 %v1965_v35 }
  0x4d   :  { %1448 = vmatpush1.bf16.msra.mxu1 %v1962_v34 }
  0x4e   :  { %1450 = vmatprep.subr.bf16.mxu1 %v1965_v35 }
  0x4f   :  { %1416 = vmatpush1.bf16.msra.mxu0 %v1970_v40 }
  0x50   :  { %1418 = vmatprep.subr.bf16.mxu0 %v1973_v41 }
  0x51   :  { %1452 = vmatpush1.bf16.msra.mxu1 %v1970_v40 }
  0x52   :  { %1454 = vmatprep.subr.bf16.mxu1 %v1973_v41 }
  0x53   :  { %1420 = vmatpush1.bf16.msra.mxu0 %v1978_v46 }
  0x54   :  { %1422 = vmatprep.subr.bf16.mxu0 %v1981_v47 }
  0x55   :  { %1456 = vmatpush1.bf16.msra.mxu1 %v1978_v46 }
  0x56   :  { %1458 = vmatprep.subr.bf16.mxu1 %v1981_v47 }
  0x57   :  { %1424 = vmatpush1.bf16.msra.mxu0 %v1986_v52 }
  0x58   :  { %1426 = vmatprep.subr.bf16.mxu0 %v1989_v53 }
  0x59   :  { %1460 = vmatpush1.bf16.msra.mxu1 %v1986_v52 }
  0x5a   :  { %1462 = vmatprep.subr.bf16.mxu1 %v1989_v53 }
  0x5b   :  { %1428 = vmatpush1.bf16.msra.mxu0 %v1994_v56 }
  0x5c   :  { %1466 = vmatprep.subr.bf16.mxu0 %v1927_v4 }
  0x5d   :  { %1464 = vmatpush1.bf16.msra.mxu1 %v1994_v56 }
  0x5e   :  { %261 = vmatmul.mubr.f32.vlgmr.msra.gmra.mrb[0].mxu0 %v1855_v0  ;;  %1502 = vmatprep.subr.bf16.mxu1 %v1927_v4 }
  0x5f   :  { %1468 = vmatpush1.bf16.msra.mxu0 %v1929_v8  ;;  %501 = vmatprep.mubr.f32.mxu0 %v1855_v0 }
  0x60   :  { %1470 = vmatprep.subr.bf16.mxu0 %v1931_v9 }
  0x62   :  { %1387 = vmatmul.mubr.msk.f32.vlgmr.msra.gmra.mrb[2].mxu0 %vm121_vm0, %v433_v57 }
  0x63   :  { %1472 = vmatpush1.bf16.msra.mxu0 %v1936_v15  ;;  %572 = vmatprep.mubr.f32.mxu0 %v1855_v0 }
  0x64   :  { %1474 = vmatprep.subr.bf16.mxu0 %v1940_v16 }
  0x67   :  { %1476 = vmatpush1.bf16.msra.mxu0 %v1945_v21 }
  0x68   :  { %1478 = vmatprep.subr.bf16.mxu0 %v1949_v22 }
  0x6b   :  { %1480 = vmatpush1.bf16.msra.mxu0 %v1952_v27 }
  0x6c   :  { %1482 = vmatprep.subr.bf16.mxu0 %v1955_v29 }
  0x6f   :  { %1484 = vmatpush1.bf16.msra.mxu0 %v1962_v34 }
  0x70   :  { %1486 = vmatprep.subr.bf16.mxu0 %v1965_v35 }
  0x73   :  { %1488 = vmatpush1.bf16.msra.mxu0 %v1970_v40 }
  0x74   :  { %1490 = vmatprep.subr.bf16.mxu0 %v1973_v41 }
  0x77   :  { %1492 = vmatpush1.bf16.msra.mxu0 %v1978_v46 }
  0x78   :  { %1494 = vmatprep.subr.bf16.mxu0 %v1981_v47 }
  0x7b   :  { %1496 = vmatpush1.bf16.msra.mxu0 %v1986_v52 }
  0x7c   :  { %1498 = vmatprep.subr.bf16.mxu0 %v1989_v53 }
  0x7f   :  { %1500 = vmatpush1.bf16.msra.mxu0 %v1994_v56 }
  0x80   :  { %1538 = vmatprep.subr.bf16.mxu0 %v1927_v4 }
 0x131   :  { %v262_v2 = vpop.f32.mrb[0].mxu0 }
 0x132   :  { %v1681_v3 = vadd.f32 %v262_v2, %v2030_v63  ;;  %v264_v5 = vpop.f32.mrb[1].mxu0 }
 0x133   :  { %v1682_v6 = vadd.f32 %v264_v5, %v2032_v1 }
 0x134   :  { %v267_v7 = vmul.f32 0.5, %v1681_v3 }
 0x135   :  { %1722 = vtanh.f32 %v1682_v6 }
 0x136   :  { %1724 = vtanh.f32 %v267_v7 }
 0x13f   :  { %v1723_v10 = vpop.eup %1722 }
 0x140   :  { %v1725_v11 = vpop.eup %1724  ;;  %v273_v14 = vsub.f32 0.0, %v1723_v10 }
 0x141   :  { %v271_v12 = vadd.f32 1.0, %v1725_v11 }
 0x143   :  { %v272_v13 = vmul.f32 0.5, %v271_v12 }
 0x145   :  { %v274_v17 = vmul.f32 %v273_v14, %v272_v13 }
 0x147   :  { %v275_v18 = vadd.f32 %v1723_v10, %v274_v17 }
 0x149   :  { %417 = vmatmul.mubr.f32.vlgmr.msra.gmra.mrb[0].mxu1 %v275_v18 }
 0x14a   :  { %1504 = vmatpush1.bf16.msra.mxu1 %v1929_v8  ;;  %657 = vmatprep.mubr.f32.mxu1 %v1855_v0 }
 0x14b   :  { %1506 = vmatprep.subr.bf16.mxu1 %v1931_v9 }
 0x14d   :  { %1388 = vmatmul.mubr.msk.f32.vlgmr.msra.gmra.mrb[2].mxu1 %vm121_vm0, %v589_v19 }
 0x14e   :  { %1508 = vmatpush1.bf16.msra.mxu1 %v1936_v15  ;;  %728 = vmatprep.mubr.f32.mxu1 %v1855_v0 }
 0x14f   :  { %1510 = vmatprep.subr.bf16.mxu1 %v1940_v16 }
 0x152   :  { %1512 = vmatpush1.bf16.msra.mxu1 %v1945_v21 }
 0x153   :  { %1514 = vmatprep.subr.bf16.mxu1 %v1949_v22 }
 0x156   :  { %1516 = vmatpush1.bf16.msra.mxu1 %v1952_v27 }
 0x157   :  { %1518 = vmatprep.subr.bf16.mxu1 %v1955_v29 }
 0x15a   :  { %1520 = vmatpush1.bf16.msra.mxu1 %v1962_v34 }
 0x15b   :  { %1522 = vmatprep.subr.bf16.mxu1 %v1965_v35 }
 0x15e   :  { %1524 = vmatpush1.bf16.msra.mxu1 %v1970_v40 }
 0x15f   :  { %1526 = vmatprep.subr.bf16.mxu1 %v1973_v41 }
 0x162   :  { %1528 = vmatpush1.bf16.msra.mxu1 %v1978_v46 }
 0x163   :  { %1530 = vmatprep.subr.bf16.mxu1 %v1981_v47 }
 0x166   :  { %1532 = vmatpush1.bf16.msra.mxu1 %v1986_v52 }
 0x167   :  { %1534 = vmatprep.subr.bf16.mxu1 %v1989_v53 }
 0x16a   :  { %1536 = vmatpush1.bf16.msra.mxu1 %v1994_v56 }
 0x16b   :  { %1574 = vmatprep.subr.bf16.mxu1 %v1927_v4 }
 0x21c   :  { %v418_v20 = vpop.f32.mrb[0].mxu1 }
 0x21d   :  { %v1683_v23 = vadd.f32 %v418_v20, %v2030_v63  ;;  %v420_v24 = vpop.f32.mrb[1].mxu1 }
 0x21e   :  { %v1684_v25 = vadd.f32 %v420_v24, %v2032_v1 }
 0x21f   :  { %v423_v26 = vmul.f32 0.5, %v1683_v23 }
 0x220   :  { %1726 = vtanh.f32 %v1684_v25 }
 0x221   :  { %1728 = vtanh.f32 %v423_v26 }
 0x22a   :  { %v1727_v28 = vpop.eup %1726 }
 0x22b   :  { %v1729_v30 = vpop.eup %1728  ;;  %v429_v33 = vsub.f32 %v275_v18, %v1727_v28 }
 0x22c   :  { %v427_v31 = vadd.f32 1.0, %v1729_v30 }
 0x22e   :  { %v428_v32 = vmul.f32 0.5, %v427_v31  ;;  %v1213_v31 = vld [vmem:[#allocation7 + $0x38] sm:$0xff] }
 0x230   :  { %v430_v36 = vmul.f32 %v429_v33, %v428_v32 }
 0x232   :  { %v431_v37 = vadd.f32 %v1727_v28, %v430_v36 }
 0x234   :  { %573 = vmatmul.mubr.f32.vlgmr.msra.gmra.mrb[2].mxu0 %v431_v37 }
 0x235   :  { %1540 = vmatpush1.bf16.msra.mxu0 %v1929_v8  ;;  %813 = vmatprep.mubr.f32.mxu0 %v1855_v0 }
 0x236   :  { %1542 = vmatprep.subr.bf16.mxu0 %v1931_v9 }
 0x238   :  { %1389 = vmatmul.mubr.msk.f32.vlgmr.msra.gmra.mrb[4].mxu0 %vm121_vm0, %v745_v38 }
 0x239   :  { %1544 = vmatpush1.bf16.msra.mxu0 %v1936_v15  ;;  %884 = vmatprep.mubr.f32.mxu0 %v1855_v0 }
 0x23a   :  { %1546 = vmatprep.subr.bf16.mxu0 %v1940_v16 }
 0x23d   :  { %1548 = vmatpush1.bf16.msra.mxu0 %v1945_v21 }
 0x23e   :  { %1550 = vmatprep.subr.bf16.mxu0 %v1949_v22 }
 0x241   :  { %1552 = vmatpush1.bf16.msra.mxu0 %v1952_v27 }
 0x242   :  { %1554 = vmatprep.subr.bf16.mxu0 %v1955_v29 }
 0x245   :  { %1556 = vmatpush1.bf16.msra.mxu0 %v1962_v34 }
 0x246   :  { %1558 = vmatprep.subr.bf16.mxu0 %v1965_v35 }
 0x249   :  { %1560 = vmatpush1.bf16.msra.mxu0 %v1970_v40 }
 0x24a   :  { %1562 = vmatprep.subr.bf16.mxu0 %v1973_v41 }
 0x24d   :  { %1564 = vmatpush1.bf16.msra.mxu0 %v1978_v46 }
 0x24e   :  { %1566 = vmatprep.subr.bf16.mxu0 %v1981_v47 }
 0x251   :  { %1568 = vmatpush1.bf16.msra.mxu0 %v1986_v52 }
 0x252   :  { %1570 = vmatprep.subr.bf16.mxu0 %v1989_v53 }
 0x255   :  { %1572 = vmatpush1.bf16.msra.mxu0 %v1994_v56 }
 0x256   :  { %1610 = vmatprep.subr.bf16.mxu0 %v1927_v4 }
 0x307   :  { %v574_v39 = vpop.f32.mrb[2].mxu0 }
 0x308   :  { %v1685_v42 = vadd.f32 %v574_v39, %v2030_v63  ;;  %v576_v43 = vpop.f32.mrb[3].mxu0 }
 0x309   :  { %v1686_v44 = vadd.f32 %v576_v43, %v2032_v1 }
 0x30a   :  { %v579_v45 = vmul.f32 0.5, %v1685_v42 }
 0x30b   :  { %1730 = vtanh.f32 %v1686_v44 }
 0x30c   :  { %1732 = vtanh.f32 %v579_v45 }
 0x315   :  { %v1731_v48 = vpop.eup %1730 }
 0x316   :  { %v1733_v49 = vpop.eup %1732  ;;  %v585_v54 = vsub.f32 %v431_v37, %v1731_v48 }
 0x317   :  { %v583_v50 = vadd.f32 1.0, %v1733_v49 }
 0x319   :  { %v584_v51 = vmul.f32 0.5, %v583_v50 }
 0x31b   :  { %v586_v55 = vmul.f32 %v585_v54, %v584_v51 }
 0x31d   :  { %v587_v57 = vadd.f32 %v1731_v48, %v586_v55 }
 0x31f   :  { %729 = vmatmul.mubr.f32.vlgmr.msra.gmra.mrb[2].mxu1 %v587_v57 }
 0x320   :  { %1576 = vmatpush1.bf16.msra.mxu1 %v1929_v8  ;;  %969 = vmatprep.mubr.f32.mxu1 %v1855_v0 }
 0x321   :  { %1578 = vmatprep.subr.bf16.mxu1 %v1931_v9 }
 0x323   :  { %1390 = vmatmul.mubr.msk.f32.vlgmr.msra.gmra.mrb[4].mxu1 %vm121_vm0, %v901_v58 }
 0x324   :  { %1580 = vmatpush1.bf16.msra.mxu1 %v1936_v15  ;;  %1040 = vmatprep.mubr.f32.mxu1 %v1855_v0 }
 0x325   :  { %1582 = vmatprep.subr.bf16.mxu1 %v1940_v16 }
 0x328   :  { %1584 = vmatpush1.bf16.msra.mxu1 %v1945_v21 }
 0x329   :  { %1586 = vmatprep.subr.bf16.mxu1 %v1949_v22 }
 0x32c   :  { %1588 = vmatpush1.bf16.msra.mxu1 %v1952_v27 }
 0x32d   :  { %1590 = vmatprep.subr.bf16.mxu1 %v1955_v29 }
 0x330   :  { %1592 = vmatpush1.bf16.msra.mxu1 %v1962_v34 }
 0x331   :  { %1594 = vmatprep.subr.bf16.mxu1 %v1965_v35 }
 0x334   :  { %1596 = vmatpush1.bf16.msra.mxu1 %v1970_v40 }
 0x335   :  { %1598 = vmatprep.subr.bf16.mxu1 %v1973_v41 }
 0x338   :  { %1600 = vmatpush1.bf16.msra.mxu1 %v1978_v46 }
 0x339   :  { %1602 = vmatprep.subr.bf16.mxu1 %v1981_v47 }
 0x33c   :  { %1604 = vmatpush1.bf16.msra.mxu1 %v1986_v52 }
 0x33d   :  { %1606 = vmatprep.subr.bf16.mxu1 %v1989_v53 }
 0x340   :  { %1608 = vmatpush1.bf16.msra.mxu1 %v1994_v56 }
 0x341   :  { %1646 = vmatprep.subr.bf16.mxu1 %v1927_v4  ;;  %v1057_v4 = vld [vmem:[#allocation7 + $0x30] sm:$0xff] }
 0x3f2   :  { %v730_v59 = vpop.f32.mrb[2].mxu1 }
 0x3f3   :  { %v1687_v60 = vadd.f32 %v730_v59, %v2030_v63  ;;  %v732_v61 = vpop.f32.mrb[3].mxu1 }
 0x3f4   :  { %v1688_v62 = vadd.f32 %v732_v61, %v2032_v1 }
 0x3f5   :  { %v735_v2 = vmul.f32 0.5, %v1687_v60 }
 0x3f6   :  { %1734 = vtanh.f32 %v1688_v62 }
 0x3f7   :  { %1736 = vtanh.f32 %v735_v2 }
 0x400   :  { %v1735_v3 = vpop.eup %1734 }
 0x401   :  { %v1737_v5 = vpop.eup %1736  ;;  %v741_v10 = vsub.f32 %v587_v57, %v1735_v3 }
 0x402   :  { %v739_v6 = vadd.f32 1.0, %v1737_v5 }
 0x404   :  { %v740_v7 = vmul.f32 0.5, %v739_v6 }
 0x406   :  { %v742_v11 = vmul.f32 %v741_v10, %v740_v7 }
 0x408   :  { %v743_v12 = vadd.f32 %v1735_v3, %v742_v11 }
 0x40a   :  { %885 = vmatmul.mubr.f32.vlgmr.msra.gmra.mrb[4].mxu0 %v743_v12 }
 0x40b   :  { %1612 = vmatpush1.bf16.msra.mxu0 %v1929_v8  ;;  %1125 = vmatprep.mubr.f32.mxu0 %v1855_v0 }
 0x40c   :  { %1614 = vmatprep.subr.bf16.mxu0 %v1931_v9 }
 0x40e   :  { %1391 = vmatmul.mubr.msk.f32.vlgmr.msra.gmra.mrb[6].mxu0 %vm121_vm0, %v1057_v4 }
 0x40f   :  { %1616 = vmatpush1.bf16.msra.mxu0 %v1936_v15  ;;  %1196 = vmatprep.mubr.f32.mxu0 %v1855_v0 }
 0x410   :  { %1618 = vmatprep.subr.bf16.mxu0 %v1940_v16 }
 0x413   :  { %1620 = vmatpush1.bf16.msra.mxu0 %v1945_v21 }
 0x414   :  { %1622 = vmatprep.subr.bf16.mxu0 %v1949_v22 }
 0x417   :  { %1624 = vmatpush1.bf16.msra.mxu0 %v1952_v27 }
 0x418   :  { %1626 = vmatprep.subr.bf16.mxu0 %v1955_v29 }
 0x41b   :  { %1628 = vmatpush1.bf16.msra.mxu0 %v1962_v34 }
 0x41c   :  { %1630 = vmatprep.subr.bf16.mxu0 %v1965_v35 }
 0x41f   :  { %1632 = vmatpush1.bf16.msra.mxu0 %v1970_v40 }
 0x420   :  { %1634 = vmatprep.subr.bf16.mxu0 %v1973_v41 }
 0x423   :  { %1636 = vmatpush1.bf16.msra.mxu0 %v1978_v46 }
 0x424   :  { %1638 = vmatprep.subr.bf16.mxu0 %v1981_v47 }
 0x427   :  { %1640 = vmatpush1.bf16.msra.mxu0 %v1986_v52 }
 0x428   :  { %1642 = vmatprep.subr.bf16.mxu0 %v1989_v53 }
 0x42b   :  { %1644 = vmatpush1.bf16.msra.mxu0 %v1994_v56 }
 0x4dd   :  { %v886_v13 = vpop.f32.mrb[4].mxu0 }
 0x4de   :  { %v1689_v14 = vadd.f32 %v886_v13, %v2030_v63  ;;  %v888_v17 = vpop.f32.mrb[5].mxu0 }
 0x4df   :  { %v1690_v18 = vadd.f32 %v888_v17, %v2032_v1 }
 0x4e0   :  { %v891_v19 = vmul.f32 0.5, %v1689_v14 }
 0x4e1   :  { %1738 = vtanh.f32 %v1690_v18 }
 0x4e2   :  { %1740 = vtanh.f32 %v891_v19 }
 0x4eb   :  { %v1739_v20 = vpop.eup %1738 }
 0x4ec   :  { %v1741_v23 = vpop.eup %1740  ;;  %v897_v26 = vsub.f32 %v743_v12, %v1739_v20 }
 0x4ed   :  { %v895_v24 = vadd.f32 1.0, %v1741_v23 }
 0x4ef   :  { %v896_v25 = vmul.f32 0.5, %v895_v24 }
 0x4f1   :  { %v898_v28 = vmul.f32 %v897_v26, %v896_v25 }
 0x4f3   :  { %v899_v30 = vadd.f32 %v1739_v20, %v898_v28 }
 0x4f5   :  { %1041 = vmatmul.mubr.f32.vlgmr.msra.gmra.mrb[4].mxu1 %v899_v30 }
 0x4f6   :  { %1648 = vmatpush1.bf16.msra.mxu1 %v1929_v8  ;;  %1281 = vmatprep.mubr.f32.mxu1 %v1855_v0 }
 0x4f7   :  { %1650 = vmatprep.subr.bf16.mxu1 %v1931_v9 }
 0x4f9   :  { %1392 = vmatmul.mubr.msk.f32.vlgmr.msra.gmra.mrb[6].mxu1 %vm121_vm0, %v1213_v31 }
 0x4fa   :  { %1652 = vmatpush1.bf16.msra.mxu1 %v1936_v15  ;;  %1352 = vmatprep.mubr.f32.mxu1 %v1855_v0 }
 0x4fb   :  { %1654 = vmatprep.subr.bf16.mxu1 %v1940_v16 }
 0x4fe   :  { %1656 = vmatpush1.bf16.msra.mxu1 %v1945_v21 }
 0x4ff   :  { %1658 = vmatprep.subr.bf16.mxu1 %v1949_v22 }
 0x502   :  { %1660 = vmatpush1.bf16.msra.mxu1 %v1952_v27 }
 0x503   :  { %1662 = vmatprep.subr.bf16.mxu1 %v1955_v29 }
 0x506   :  { %1664 = vmatpush1.bf16.msra.mxu1 %v1962_v34 }
 0x507   :  { %1666 = vmatprep.subr.bf16.mxu1 %v1965_v35 }
 0x50a   :  { %1668 = vmatpush1.bf16.msra.mxu1 %v1970_v40 }
 0x50b   :  { %1670 = vmatprep.subr.bf16.mxu1 %v1973_v41 }
 0x50e   :  { %1672 = vmatpush1.bf16.msra.mxu1 %v1978_v46 }
 0x50f   :  { %1674 = vmatprep.subr.bf16.mxu1 %v1981_v47 }
 0x512   :  { %1676 = vmatpush1.bf16.msra.mxu1 %v1986_v52 }
 0x513   :  { %1678 = vmatprep.subr.bf16.mxu1 %v1989_v53 }
 0x516   :  { %1680 = vmatpush1.bf16.msra.mxu1 %v1994_v56 }
 0x5c8   :  { %v1042_v0 = vpop.f32.mrb[4].mxu1 }
 0x5c9   :  { %v1691_v8 = vadd.f32 %v1042_v0, %v2030_v63  ;;  %v1044_v9 = vpop.f32.mrb[5].mxu1 }
 0x5ca   :  { %v1692_v15 = vadd.f32 %v1044_v9, %v2032_v1 }
 0x5cb   :  { %v1047_v16 = vmul.f32 0.5, %v1691_v8 }
 0x5cc   :  { %1742 = vtanh.f32 %v1692_v15 }
 0x5cd   :  { %1744 = vtanh.f32 %v1047_v16 }
 0x5d6   :  { %v1743_v21 = vpop.eup %1742 }
 0x5d7   :  { %v1745_v22 = vpop.eup %1744  ;;  %v1053_v34 = vsub.f32 %v899_v30, %v1743_v21 }
 0x5d8   :  { %v1051_v27 = vadd.f32 1.0, %v1745_v22 }
 0x5da   :  { %v1052_v29 = vmul.f32 0.5, %v1051_v27 }
 0x5dc   :  { %v1054_v35 = vmul.f32 %v1053_v34, %v1052_v29 }
 0x5de   :  { %v1055_v40 = vadd.f32 %v1743_v21, %v1054_v35 }
 0x5e0   :  { %1197 = vmatmul.mubr.f32.vlgmr.msra.gmra.mrb[6].mxu0 %v1055_v40 }
 0x6b3   :  { %v1198_v41 = vpop.f32.mrb[6].mxu0 }
 0x6b4   :  { %v1693_v46 = vadd.f32 %v1198_v41, %v2030_v63  ;;  %v1200_v47 = vpop.f32.mrb[7].mxu0 }
 0x6b5   :  { %v1694_v52 = vadd.f32 %v1200_v47, %v2032_v1 }
 0x6b6   :  { %v1203_v53 = vmul.f32 0.5, %v1693_v46 }
 0x6b7   :  { %1746 = vtanh.f32 %v1694_v52 }
 0x6b8   :  { %1748 = vtanh.f32 %v1203_v53 }
 0x6c1   :  { %v1747_v56 = vpop.eup %1746 }
 0x6c2   :  { %v1749_v32 = vpop.eup %1748  ;;  %v1209_v37 = vsub.f32 %v1055_v40, %v1747_v56 }
 0x6c3   :  { %v1207_v33 = vadd.f32 1.0, %v1749_v32 }
 0x6c5   :  { %v1208_v36 = vmul.f32 0.5, %v1207_v33 }
 0x6c7   :  { %v1210_v38 = vmul.f32 %v1209_v37, %v1208_v36 }
 0x6c9   :  { %v1211_v39 = vadd.f32 %v1747_v56, %v1210_v38 }
 0x6cb   :  { %1353 = vmatmul.mubr.f32.vlgmr.msra.gmra.mrb[6].mxu1 %v1211_v39 }
 0x79e   :  { %v1354_v42 = vpop.f32.mrb[6].mxu1 }
 0x79f   :  { %v1695_v43 = vadd.f32 %v1354_v42, %v2030_v63  ;;  %v1356_v44 = vpop.f32.mrb[7].mxu1 }
 0x7a0   :  { %v1696_v45 = vadd.f32 %v1356_v44, %v2032_v1 }
 0x7a1   :  { %v1359_v48 = vmul.f32 0.5, %v1695_v43 }
 0x7a2   :  { %1750 = vtanh.f32 %v1696_v45 }
 0x7a3   :  { %1752 = vtanh.f32 %v1359_v48 }
 0x7ac   :  { %v1751_v49 = vpop.eup %1750 }
 0x7ad   :  { %v1753_v50 = vpop.eup %1752  ;;  %v1365_v55 = vsub.f32 %v1211_v39, %v1751_v49 }
 0x7ae   :  { %v1363_v51 = vadd.f32 1.0, %v1753_v50 }
 0x7b0   :  { %v1364_v54 = vmul.f32 0.5, %v1363_v51 }
 0x7b2   :  { %v1366_v57 = vmul.f32 %v1365_v55, %v1364_v54 }
 0x7b4   :  { %v1367_v58 = vadd.f32 %v1751_v49, %v1366_v57 }
 0x7b6   :  { %1368 = vst [vmem:[#allocation8] sm:$0xff] %v1367_v58 }
 0x7b7   :  { %1831 = shalt.err (!%p1828_p0)
}
 0x7b8   :  { %s1832_s6 = scalar_lea.hbm %s2169_s4, 128 }
 0x7b9   :  { %p1833_p1 = scmp.ne.s32.totalorder %s2169_s4, %s1832_s6  ;;  %p1836_p2 = scmp.lt.u32.totalorder %s1832_s6, %s2169_s4 }
 0x7bb   :  { %p1838_p3 = pnand %p1836_p2, %p1833_p1 }
 0x7bd   :  { %1841 = shalt.err (!%p1838_p3)
}
 0x7be   :  { %1378 = dma.vmem_to_hbm [thread:$0]  %s1376_s28, 128, %s2169_s4, [#allocation4]  }
 0x7bf   :  { %1846 = dma.done.wait [#allocation4], 128  }
 0x7c0   :  { %1847 = vsyncadd [#allocation4], 4294967168 }
 0x7c1   :  { %1382 = vsyncpa [#allocation3], 1 }
 0x7c2   :  { %1383 = vsyncpa [#allocation6], 1 }
 0x7c3   :  { %1384 = vsyncpa [#allocation4], 1 }

</bundles_post_ra>
